<compile_context>
chip_gen: v6e
topology: v6e:2x2x1
jax: 0.10.0
libtpu: 0.0.40
codegen_flags: <defaults>
</compile_context>

<pallas_src>
import functools

import jax
import jax.numpy as jnp
from jax import lax
from jax.experimental import pallas as pl
from jax.experimental.pallas import tpu as pltpu


def _linear_kernel(x_ref, w_ref, b_ref, o_ref):
    # x_ref: (tm, feature)            x dtype (f32 or bf16)
    # w_ref: (label_num, feature)     weight dtype (native nn.Linear layout)
    # b_ref: (1, label_num)           f32
    # o_ref: (tm, label_num)          x dtype
    acc = lax.dot_general(
        x_ref[...],
        w_ref[...],
        dimension_numbers=(((1,), (1,)), ((), ())),  # contract feature vs feature
        preferred_element_type=jnp.float32,
    )
    o_ref[...] = (acc + b_ref[...]).astype(o_ref.dtype)


def _round_up(x, m):
    return ((x + m - 1) // m) * m


@functools.partial(jax.jit, static_argnames=("tile_m",))
def image_decoder_forward(x, weight, bias, *, tile_m=2048):
    """Equivalent of Image_Decoder.forward(x) == nn.Linear(feature, label)(x).

    x:      (batch, feature_size)          f32 or bf16
    weight: (label_num, feature_size)      PyTorch Linear layout, NOT transposed
    bias:   (label_num,)
    returns (batch, label_num) in x.dtype
    """
    batch, feature = x.shape
    label_num = weight.shape[0]
    b2d = bias.reshape(1, label_num).astype(jnp.float32)

    # Tile selection:
    #  * batch <= 512: one full-array block (a multi-step grid would be pure
    #    per-step overhead at these sizes).
    #  * batch  > 512: largest tile <= tile_m that is a multiple of 256 and
    #    yields >= 2 grid steps, so the "parallel" batch axis can shard across
    #    v7x's two TensorCores.
    if batch <= 512:
        tm = batch
    else:
        tm = min(tile_m, max(256, _round_up(pl.cdiv(batch, 2), 256)))
    grid = (pl.cdiv(batch, tm),)

    # Explicit VMEM budget: double-buffered x/out tiles + (conservatively also
    # double-buffered) resident weight/bias + 4 MiB slack.
    x_itemsize = jnp.dtype(x.dtype).itemsize
    w_itemsize = jnp.dtype(weight.dtype).itemsize
    x_tile_bytes = tm * feature * x_itemsize
    o_tile_bytes = tm * label_num * x_itemsize
    w_bytes = label_num * feature * w_itemsize
    b_bytes = label_num * 4
    vmem_limit = int(
        2 * (x_tile_bytes + o_tile_bytes) + 2 * (w_bytes + b_bytes) + (4 << 20)
    )
    vmem_limit = max(vmem_limit, 16 << 20)

    # Advisory cost hint for XLA's scheduler around this custom call.
    cost = pl.CostEstimate(
        flops=2 * batch * feature * label_num,
        transcendentals=0,
        bytes_accessed=(
            batch * feature * x_itemsize          # x read
            + w_bytes + b_bytes                   # params read
            + batch * label_num * x_itemsize      # out write
        ),
    )

    return pl.pallas_call(
        _linear_kernel,
        out_shape=jax.ShapeDtypeStruct((batch, label_num), x.dtype),
        grid_spec=pltpu.PrefetchScalarGridSpec(
            num_scalar_prefetch=0,
            grid=grid,
            in_specs=[
                pl.BlockSpec((tm, feature), lambda i: (i, 0)),          # x tile (streamed)
                pl.BlockSpec((label_num, feature), lambda i: (0, 0)),   # weight (resident)
                pl.BlockSpec((1, label_num), lambda i: (0, 0)),         # bias (resident)
            ],
            out_specs=pl.BlockSpec((tm, label_num), lambda i: (i, 0)),
        ),
        compiler_params=pltpu.CompilerParams(
            dimension_semantics=("parallel",),
            vmem_limit_bytes=vmem_limit,
        ),
        cost_estimate=cost,
    )(x, weight, b2d)


if __name__ == "__main__":
    # Small shapes consistent with the module's forward: x is (batch, feature_size).
    batch = 8
    feature_size = 256
    label_num = 3

    key = jax.random.PRNGKey(0)
    kx, kw, kb = jax.random.split(key, 3)

    x = jax.random.normal(kx, (batch, feature_size), dtype=jnp.float32)
    # Deterministic parameter init (mimics nn.Linear's uniform(-1/sqrt(fan_in), ...)).
    bound = 1.0 / (feature_size ** 0.5)
    weight = jax.random.uniform(
        kw, (label_num, feature_size), minval=-bound, maxval=bound, dtype=jnp.float32
    )
    bias = jax.random.uniform(
        kb, (label_num,), minval=-bound, maxval=bound, dtype=jnp.float32
    )

    y = image_decoder_forward(x, weight, bias)
    y = jax.block_until_ready(y)

    # Reference check against plain JAX.
    y_ref = x @ weight.T + bias
    assert y.shape == (batch, label_num)
    assert jnp.allclose(y, y_ref, atol=1e-5, rtol=1e-5)

    print("KERNEL_OK")
</pallas_src>

<mosaic_0001>
module attributes {stable_mosaic.version = 11 : i64} {
  func.func @_linear_kernel(%arg0: i32, %arg1: memref<8x256xf32, #tpu.memory_space<vmem>>, %arg2: memref<3x256xf32, #tpu.memory_space<vmem>>, %arg3: memref<1x3xf32, #tpu.memory_space<vmem>>, %arg4: memref<8x3xf32, #tpu.memory_space<vmem>>) attributes {dimension_semantics = [#tpu.dimension_semantics<parallel>], iteration_bounds = array<i64: 1>, scalar_prefetch = 0 : i64, scratch_operands = 0 : i64, tpu.core_type = #tpu.core_type<tc>, window_params = [{transform_indices = @transform_0, window_bounds = array<i64: 8, 256>}, {pipeline_mode = #tpu.pipeline_mode<synchronous>, transform_indices = @transform_1, window_bounds = array<i64: 3, 256>}, {pipeline_mode = #tpu.pipeline_mode<synchronous>, transform_indices = @transform_2, window_bounds = array<i64: 1, 3>}, {transform_indices = @transform_3, window_bounds = array<i64: 8, 3>}]} {
    %c0 = arith.constant 0 : index
    %c0_0 = arith.constant 0 : index
    %0 = vector.load %arg1[%c0, %c0_0] : memref<8x256xf32, #tpu.memory_space<vmem>>, vector<8x256xf32>
    %c0_1 = arith.constant 0 : index
    %c0_2 = arith.constant 0 : index
    %1 = vector.load %arg2[%c0_1, %c0_2] : memref<3x256xf32, #tpu.memory_space<vmem>>, vector<3x256xf32>
    %cst = arith.constant dense<0.000000e+00> : vector<8x3xf32>
    %2 = tpu.matmul %0, %1, %cst {dimension_numbers = #tpu.dot_dimension_numbers<[1], [1], [0], [0], [0, 0, 1, 0], [], []>} : vector<8x256xf32>, vector<3x256xf32>, vector<8x3xf32> -> vector<8x3xf32>
    %c0_3 = arith.constant 0 : index
    %c0_4 = arith.constant 0 : index
    %3 = vector.load %arg3[%c0_3, %c0_4] : memref<1x3xf32, #tpu.memory_space<vmem>>, vector<1x3xf32>
    %4 = vector.broadcast %3 : vector<1x3xf32> to vector<8x3xf32>
    %5 = arith.addf %2, %4 : vector<8x3xf32>
    %c0_5 = arith.constant 0 : index
    %c0_6 = arith.constant 0 : index
    %6 = vector.load %arg4[%c0_5, %c0_6] : memref<8x3xf32, #tpu.memory_space<vmem>>, vector<8x3xf32>
    tpu.vector_store %arg4[%c0_5, %c0_6], %5 {strides = array<i32>} : memref<8x3xf32, #tpu.memory_space<vmem>>, vector<8x3xf32>,
    return
  }
  func.func @transform_0(%arg0: i32) -> (i32, i32) {
    %c0_i32 = arith.constant 0 : i32
    %c0_i32_0 = arith.constant 0 : i32
    return %arg0, %c0_i32 : i32, i32
  }
  func.func @transform_1(%arg0: i32) -> (i32, i32) {
    %c0_i32 = arith.constant 0 : i32
    %c0_i32_0 = arith.constant 0 : i32
    %c0_i32_1 = arith.constant 0 : i32
    return %c0_i32, %c0_i32_0 : i32, i32
  }
  func.func @transform_2(%arg0: i32) -> (i32, i32) {
    %c0_i32 = arith.constant 0 : i32
    %c0_i32_0 = arith.constant 0 : i32
    %c0_i32_1 = arith.constant 0 : i32
    return %c0_i32, %c0_i32_0 : i32, i32
  }
  func.func @transform_3(%arg0: i32) -> (i32, i32) {
    %c0_i32 = arith.constant 0 : i32
    %c0_i32_0 = arith.constant 0 : i32
    return %arg0, %c0_i32 : i32, i32
  }
}

</mosaic_0001>

<bundles_post_ra>
// kernel: image_decoder_forward.1
= control target key start
LH: loop header
LB: loop body
LE: loop exit
PB: predicated region body
PF: predicated region fallthrough
CT: control target
= control target key end

     0   :  { %8 = vsyncpa [#allocation3], 0  ;;  %s211_s0 = inlined_call_operand.hbm [shape: f32[8,256], index: 0, kind: input, shape index: {}]   ;;  %s212_s1 = inlined_call_operand.hbm [shape: f32[3,256], index: 1, kind: input, shape index: {}]   ;;  %s213_s2 = inlined_call_operand.vmem [shape: f32[1,3], index: 2, kind: input, shape index: {}]   ;;  %s214_s3 = inlined_call_operand.vmem [shape: f32[8,3], index: 3, kind: output, shape index: {}]  }
   0x1   :  { %9 = vsyncpa [#allocation5], 0  ;;  %s177_s12 = smov [#allocation2]   ;;  %s178_s14 = smov [#allocation4]  }
   0x2   :  { %s16_s13 = sshll.u32 %s177_s12, 4  ;;  %s26_s15 = sshll.u32 %s178_s14, 4  ;;  %s17_s13 = int_to_ptr.vmem [resolvable:$true] %s16_s13  ;;  %s27_s15 = int_to_ptr.vmem [resolvable:$true] %s26_s15 }
   0x3   :  { %s141_s16 = scalar_lea.vmem %s17_s13, 256  ;;  %p146_p1 = scmp.lt.s32.totalorder %s17_s13, %s17_s13 }
   0x4   :  { %p142_p0 = scmp.ne.s32.totalorder %s17_s13, %s141_s16  ;;  %p147_p2 = scmp.lt.s32.totalorder %s141_s16, %s141_s16 }
   0x6   :  { %p148_p3 = por %p147_p2, %p146_p1 }
   0x8   :  { %p149_p4 = pnand %p148_p3, %p142_p0 }
   0xa   :  { %152 = shalt.err (!%p149_p4)
}
   0xb   :  { %19 = dma.hbm_to_vmem [thread:$0]  %s211_s0, 256, %s17_s13, [#allocation3]  }
   0xc   :  { %s161_s19 = scalar_lea.vmem %s27_s15, 128  ;;  %p166_p6 = scmp.lt.s32.totalorder %s27_s15, %s27_s15 }
   0xd   :  { %p162_p5 = scmp.ne.s32.totalorder %s27_s15, %s161_s19  ;;  %p167_p7 = scmp.lt.s32.totalorder %s161_s19, %s161_s19 }
   0xf   :  { %p168_p8 = por %p167_p7, %p166_p6 }
  0x11   :  { %p169_p9 = pnand %p168_p8, %p162_p5 }
  0x13   :  { %172 = shalt.err (!%p169_p9)
}
  0x14   :  { %29 = dma.hbm_to_vmem [thread:$0]  %s212_s1, 128, %s27_s15, [#allocation5]  }
  0x15   :  { %173 = dma.done.wait [#allocation3], 256  }
  0x16   :  { %174 = vsyncadd [#allocation3], 4294967040 }
  0x17   :  { %175 = dma.done.wait [#allocation5], 128  }
  0x18   :  { %176 = vsyncadd [#allocation5], 4294967168  ;;  %v40_v0 = vld [vmem:[#allocation4] sm:$0x77]  ;;  %v39_v1 = vld [vmem:[#allocation2 + $0x8] sm:$0xff]  ;;  %vm121_vm0 = vcmask 23552  }
  0x19   :  { %v49_v2 = vcombine.high %v40_v0, %v40_v0  ;;  %115 = vmatprep.mubr.f32.mxu0 %v39_v1  ;;  %v38_v3 = vld [vmem:[#allocation2] sm:$0xff] }
  0x1a   :  { %v129_v4 = vld [vmem:[%s213_s2] ss:$0 sm:$0xff] }
  0x1b   :  { %81 = vmatprep.subr.mxu0 %v49_v2 }
  0x1c   :  { %82 = vmatpush1.xpose.msra.mxu0 %v40_v0 }
  0x1f   :  { %116 = vmatmul.mubr.f32.vlgmr.msra.gmra.mxu0 %v38_v3 }
  0xdf   :  { %v117_v5 = vpop.f32.mrf.mxu0 }
  0xe0   :  { %v118_v6 = vadd.f32 %v129_v4, %v117_v5 }
  0xe1   :  { %v119_v7 = vpop.f32.mrf.mxu0 }
  0xe2   :  { %122 = vst.msk [vmem:[%s214_s3] sm:$0xff] %vm121_vm0, %v118_v6 }
  0xe3   :  { %127 = vsyncpa [#allocation3], 1 }
  0xe4   :  { %128 = vsyncpa [#allocation5], 1 }

</bundles_post_ra>
